<compile_context>
chip_gen: v7x
topology: tpu7x:2x2x1
jax: 0.10.0
libtpu: 0.0.40
codegen_flags: <defaults>
</compile_context>

<pallas_src>
import functools

import jax
import jax.numpy as jnp
from jax.experimental import pallas as pl
from jax.experimental.pallas import tpu as pltpu


def mlp_kernel(x_ref, w1_ref, b1_ref, w23_ref, b23_ref, o_ref):
    # Cast the streamed x tile to bf16 in VMEM (MXU operand); f32 accumulate.
    x_bf16 = x_ref[...].astype(jnp.bfloat16)
    h1 = jnp.dot(x_bf16, w1_ref[...], preferred_element_type=jnp.float32)
    h1 = jnp.maximum(h1 + b1_ref[...], 0.0)                    # (tile_b, 128)

    # Fused layers 2+3 (no nonlinearity between them): one tiny f32 matmul.
    out = jnp.dot(h1, w23_ref[...], preferred_element_type=jnp.float32)
    o_ref[...] = (out + b23_ref[...]).astype(o_ref.dtype)      # (tile_b, 10)


def _round_up(n, m):
    return ((n + m - 1) // m) * m


def prepare_params(params):
    """One-time parameter prep; call once and reuse across forward calls."""
    w1, b1, w2, b2, w3, b3 = params
    w23 = jnp.dot(w2, w3)                                      # (128, 10)
    b23 = jnp.dot(b2, w3) + b3                                 # (1, 10)
    return (w1.astype(jnp.bfloat16), b1, w23, b23)


def network_forward(x, prepped_params, *, tile_b=None):
    """x: (B, 3, 32, 32) float32 (or bfloat16) NCHW. Returns (B, 10) float32."""
    B = x.shape[0]
    x_flat = x.reshape(B, -1)                                  # (B, 3072) == torch .view

    w1_bf16, b1, w23, b23 = prepped_params
    K, H = w1_bf16.shape                                       # 3072, 128
    N = w23.shape[1]                                           # 10

    if tile_b is None:
        # Multiple of 16 (bf16 sublane packing); capped at 256 so double-
        # buffered f32 x tiles fit v5e's default scoped VMEM, and so B > 256
        # gives >= 2 grid steps for the v7x megacore split.
        tile_b = min(256, _round_up(B, 16))

    # Weights/biases: constant index_map (VMEM-resident) + single-buffered.
    resident = functools.partial(pl.BlockSpec, pipeline_mode=pl.Buffered(1))

    out = pl.pallas_call(
        mlp_kernel,
        out_shape=jax.ShapeDtypeStruct((B, N), jnp.float32),
        grid_spec=pl.GridSpec(
            grid=(pl.cdiv(B, tile_b),),                        # ragged last block OK
            in_specs=[
                pl.BlockSpec((tile_b, K), lambda i: (i, 0)),   # x tile (streamed, f32)
                resident((K, H), lambda i: (0, 0)),            # w1 (bf16, resident)
                resident((1, H), lambda i: (0, 0)),            # b1 (resident)
                resident((H, N), lambda i: (0, 0)),            # fused w23 (resident)
                resident((1, N), lambda i: (0, 0)),            # fused b23 (resident)
            ],
            out_specs=pl.BlockSpec((tile_b, N), lambda i: (i, 0)),
        ),
        compiler_params=pltpu.CompilerParams(
            dimension_semantics=("parallel",),
        ),
    )(x_flat, w1_bf16, b1, w23, b23)

    return out


def init_params(key):
    """Deterministic init mimicking nn.Linear (uniform in +-1/sqrt(fan_in)).

    Weights are created with shape (in_features, out_features)."""
    dims = [(3072, 128), (128, 32), (32, 10)]
    params = []
    for (fan_in, fan_out) in dims:
        key, kw, kb = jax.random.split(key, 3)
        bound = 1.0 / jnp.sqrt(jnp.float32(fan_in))
        w = jax.random.uniform(kw, (fan_in, fan_out), jnp.float32, -bound, bound)
        b = jax.random.uniform(kb, (1, fan_out), jnp.float32, -bound, bound)
        params.extend([w, b])
    return tuple(params)


if __name__ == "__main__":
    key = jax.random.PRNGKey(0)
    k_params, k_x = jax.random.split(key)

    params = init_params(k_params)
    prepped = prepare_params(params)     # one-time weight prep (hoisted)

    # CIFAR-like input: batch=8, NCHW (3, 32, 32) -> flattens to 3072 features.
    B = 8
    x = jax.random.normal(k_x, (B, 3, 32, 32), dtype=jnp.float32)

    out = network_forward(x, prepped)
    jax.block_until_ready(out)
    assert out.shape == (B, 10)

    w1, b1, w2, b2, w3, b3 = params
    xf = x.reshape(B, -1)

    # Reference 1: same numerics as the kernel (bf16 layer-1 operands, fused 2+3).
    w23 = w2 @ w3
    b23 = b2 @ w3 + b3
    h1 = jnp.maximum(
        jnp.dot(xf.astype(jnp.bfloat16), w1.astype(jnp.bfloat16),
                preferred_element_type=jnp.float32) + b1, 0.0)
    ref_bf16 = jnp.dot(h1, w23, preferred_element_type=jnp.float32) + b23
    assert jnp.allclose(out, ref_bf16, atol=2e-3, rtol=2e-3)

    # Reference 2: original full-f32 three-matmul math (loose tolerance covers
    # the intentional bf16 layer-1 operands and the layer-2/3 fusion reorder).
    ref_f32 = (jnp.maximum(xf @ w1 + b1, 0.0) @ w2 + b2) @ w3 + b3
    assert jnp.allclose(out, ref_f32, atol=1e-1, rtol=1e-1)

    print("KERNEL_OK")
</pallas_src>

<mosaic_0001>
module attributes {stable_mosaic.version = 11 : i64} {
  func.func @mlp_kernel(%arg0: i32, %arg1: memref<16x3072xf32, #tpu.memory_space<vmem>>, %arg2: memref<3072x128xbf16, #tpu.memory_space<vmem>>, %arg3: memref<1x128xf32, #tpu.memory_space<vmem>>, %arg4: memref<128x10xf32, #tpu.memory_space<vmem>>, %arg5: memref<1x10xf32, #tpu.memory_space<vmem>>, %arg6: memref<16x10xf32, #tpu.memory_space<vmem>>) attributes {dimension_semantics = [#tpu.dimension_semantics<parallel>], iteration_bounds = array<i64: 1>, scalar_prefetch = 0 : i64, scratch_operands = 0 : i64, tpu.core_type = #tpu.core_type<tc>, window_params = [{transform_indices = @transform_0, window_bounds = array<i64: 16, 3072>}, {pipeline_mode = #tpu.pipeline_mode<synchronous>, transform_indices = @transform_1, window_bounds = array<i64: 3072, 128>}, {pipeline_mode = #tpu.pipeline_mode<synchronous>, transform_indices = @transform_2, window_bounds = array<i64: 1, 128>}, {pipeline_mode = #tpu.pipeline_mode<synchronous>, transform_indices = @transform_3, window_bounds = array<i64: 128, 10>}, {pipeline_mode = #tpu.pipeline_mode<synchronous>, transform_indices = @transform_4, window_bounds = array<i64: 1, 10>}, {transform_indices = @transform_5, window_bounds = array<i64: 16, 10>}]} {
    %c0 = arith.constant 0 : index
    %c0_0 = arith.constant 0 : index
    %0 = vector.load %arg1[%c0, %c0_0] : memref<16x3072xf32, #tpu.memory_space<vmem>>, vector<16x3072xf32>
    %1 = arith.truncf %0 : vector<16x3072xf32> to vector<16x3072xbf16>
    %c0_1 = arith.constant 0 : index
    %c0_2 = arith.constant 0 : index
    %2 = vector.load %arg2[%c0_1, %c0_2] : memref<3072x128xbf16, #tpu.memory_space<vmem>>, vector<3072x128xbf16>
    %cst = arith.constant dense<0.000000e+00> : vector<16x128xf32>
    %3 = tpu.matmul %1, %2, %cst {dimension_numbers = #tpu.dot_dimension_numbers<[1], [0], [0], [1], [0, 0, 1, 1], [], []>} : vector<16x3072xbf16>, vector<3072x128xbf16>, vector<16x128xf32> -> vector<16x128xf32>
    %c0_3 = arith.constant 0 : index
    %c0_4 = arith.constant 0 : index
    %4 = vector.load %arg3[%c0_3, %c0_4] : memref<1x128xf32, #tpu.memory_space<vmem>>, vector<1x128xf32>
    %5 = vector.broadcast %4 : vector<1x128xf32> to vector<16x128xf32>
    %6 = arith.addf %3, %5 : vector<16x128xf32>
    %cst_5 = arith.constant 0.000000e+00 : f32
    %7 = vector.broadcast %cst_5 : f32 to vector<16x128xf32>
    %8 = arith.maximumf %6, %7 : vector<16x128xf32>
    %c0_6 = arith.constant 0 : index
    %c0_7 = arith.constant 0 : index
    %9 = vector.load %arg4[%c0_6, %c0_7] : memref<128x10xf32, #tpu.memory_space<vmem>>, vector<128x10xf32>
    %cst_8 = arith.constant dense<0.000000e+00> : vector<16x10xf32>
    %10 = tpu.matmul %8, %9, %cst_8 {dimension_numbers = #tpu.dot_dimension_numbers<[1], [0], [0], [1], [0, 0, 1, 1], [], []>} : vector<16x128xf32>, vector<128x10xf32>, vector<16x10xf32> -> vector<16x10xf32>
    %c0_9 = arith.constant 0 : index
    %c0_10 = arith.constant 0 : index
    %11 = vector.load %arg5[%c0_9, %c0_10] : memref<1x10xf32, #tpu.memory_space<vmem>>, vector<1x10xf32>
    %12 = vector.broadcast %11 : vector<1x10xf32> to vector<16x10xf32>
    %13 = arith.addf %10, %12 : vector<16x10xf32>
    %c0_11 = arith.constant 0 : index
    %c0_12 = arith.constant 0 : index
    %14 = vector.load %arg6[%c0_11, %c0_12] : memref<16x10xf32, #tpu.memory_space<vmem>>, vector<16x10xf32>
    tpu.vector_store %arg6[%c0_11, %c0_12], %13 {strides = array<i32>} : memref<16x10xf32, #tpu.memory_space<vmem>>, vector<16x10xf32>,
    return
  }
  func.func @transform_0(%arg0: i32) -> (i32, i32) {
    %c0_i32 = arith.constant 0 : i32
    %c0_i32_0 = arith.constant 0 : i32
    return %arg0, %c0_i32 : i32, i32
  }
  func.func @transform_1(%arg0: i32) -> (i32, i32) {
    %c0_i32 = arith.constant 0 : i32
    %c0_i32_0 = arith.constant 0 : i32
    %c0_i32_1 = arith.constant 0 : i32
    return %c0_i32, %c0_i32_0 : i32, i32
  }
  func.func @transform_2(%arg0: i32) -> (i32, i32) {
    %c0_i32 = arith.constant 0 : i32
    %c0_i32_0 = arith.constant 0 : i32
    %c0_i32_1 = arith.constant 0 : i32
    return %c0_i32, %c0_i32_0 : i32, i32
  }
  func.func @transform_3(%arg0: i32) -> (i32, i32) {
    %c0_i32 = arith.constant 0 : i32
    %c0_i32_0 = arith.constant 0 : i32
    %c0_i32_1 = arith.constant 0 : i32
    return %c0_i32, %c0_i32_0 : i32, i32
  }
  func.func @transform_4(%arg0: i32) -> (i32, i32) {
    %c0_i32 = arith.constant 0 : i32
    %c0_i32_0 = arith.constant 0 : i32
    %c0_i32_1 = arith.constant 0 : i32
    return %c0_i32, %c0_i32_0 : i32, i32
  }
  func.func @transform_5(%arg0: i32) -> (i32, i32) {
    %c0_i32 = arith.constant 0 : i32
    %c0_i32_0 = arith.constant 0 : i32
    return %arg0, %c0_i32 : i32, i32
  }
}

</mosaic_0001>

<bundles_post_ra>
// kernel: tpu_custom_call.1
= control target key start
LH: loop header
LB: loop body
LE: loop exit
PB: predicated region body
PF: predicated region fallthrough
CT: control target
= control target key end

     0   :  { %10 = vsyncpa [#allocation3], 0  ;;  %s3223_s0 = inlined_call_operand.hbm [shape: f32[8,3072], index: 0, kind: input, shape index: {}]   ;;  %s3224_s1 = inlined_call_operand.hbm [shape: bf16[3072,128], index: 1, kind: input, shape index: {}]   ;;  %s3225_s2 = inlined_call_operand.vmem [shape: f32[1,128], index: 2, kind: input, shape index: {}]   ;;  %s3226_s3 = inlined_call_operand.vmem [shape: f32[128,10], index: 3, kind: input, shape index: {}]   ;;  %s3227_s4 = inlined_call_operand.vmem [shape: f32[1,10], index: 4, kind: input, shape index: {}]   ;;  %s3228_s5 = inlined_call_operand.hbm [shape: f32[8,10], index: 5, kind: output, shape index: {}]  }
   0x1   :  { %11 = vsyncpa [#allocation6], 0 }
   0x2   :  { %12 = vsyncpa [#allocation4], 0 }
   0x3   :  { %17 = vsyncadd [#allocation3], 3072  ;;  %s3094_s18 = smov [#allocation2]   ;;  %s3022_s22 = scalar_lea.hbm %s3223_s0, 3072 }
   0x4   :  { %s18_s19 = sshll.u32 %s3094_s18, 4  ;;  %p3023_p0 = scmp.ne.s32.totalorder %s3223_s0, %s3022_s22  ;;  %s19_s19 = int_to_ptr.vmem [resolvable:$true] %s18_s19 }
   0x5   :  { %p3026_p1 = scmp.lt.u32.totalorder %s3022_s22, %s3223_s0 }
   0x7   :  { %p3028_p2 = pnand %p3026_p1, %p3023_p0 }
   0x9   :  { %3031 = shalt.err (!%p3028_p2)
}
   0xa   :  { %s3032_s27 = scalar_lea.vmem %s19_s19, 3072  ;;  %s3036_s28 = scalar_lea.vmem %s19_s19, 6144 }
   0xb   :  { %p3033_p3 = scmp.ne.s32.totalorder %s19_s19, %s3032_s27  ;;  %p3037_p4 = scmp.lt.s32.totalorder %s19_s19, %s19_s19 }
   0xc   :  { %p3038_p5 = scmp.lt.s32.totalorder %s3036_s28, %s3032_s27 }
   0xe   :  { %p3039_p6 = por %p3038_p5, %p3037_p4 }
  0x10   :  { %p3040_p7 = pnand %p3039_p6, %p3033_p3 }
  0x12   :  { %3043 = shalt.err (!%p3040_p7)
}
  0x13   :  { %s3095_s29 = smov 3072   ;;  %s3096_s30 = smov 192  }
  0x14   :  { %24 = dma.hbm_to_vmem [thread:$0]  %s3223_s0, 3072, %s19_s19, [#allocation3], %s3095_s29, %s3095_s29, %s3096_s30  }
  0x15   :  { %s3097_s8 = smov [#allocation5]   ;;  %s3044_s12 = scalar_lea.hbm %s3224_s1, 24576 }
  0x16   :  { %s30_s9 = sshll.u32 %s3097_s8, 4  ;;  %p3045_p8 = scmp.ne.s32.totalorder %s3224_s1, %s3044_s12  ;;  %s31_s9 = int_to_ptr.vmem [resolvable:$true] %s30_s9 }
  0x17   :  { %p3048_p9 = scmp.lt.u32.totalorder %s3044_s12, %s3224_s1 }
  0x19   :  { %p3050_p10 = pnand %p3048_p9, %p3045_p8 }
  0x1b   :  { %3053 = shalt.err (!%p3050_p10)
}
  0x1c   :  { %s3054_s17 = scalar_lea.vmem %s31_s9, 24576  ;;  %p3059_p12 = scmp.lt.s32.totalorder %s31_s9, %s31_s9 }
  0x1d   :  { %p3055_p11 = scmp.ne.s32.totalorder %s31_s9, %s3054_s17  ;;  %p3060_p13 = scmp.lt.s32.totalorder %s3054_s17, %s3054_s17 }
  0x1f   :  { %p3061_p0 = por %p3060_p13, %p3059_p12 }
  0x21   :  { %p3062_p1 = pnand %p3061_p0, %p3055_p11 }
  0x23   :  { %3065 = shalt.err (!%p3062_p1)
}
  0x24   :  { %s3098_s0 = smov 64   ;;  %s3099_s18 = smov 4  }
  0x25   :  { %36 = dma.hbm_to_vmem [thread:$0]  %s3224_s1, 24576, %s31_s9, [#allocation6], %s3098_s0, %s3098_s0, %s3099_s18  }
  0x26   :  { %3088 = dma.done.wait [#allocation3], 6144  }
  0x27   :  { %3089 = vsyncadd [#allocation3], 4294961152 }
  0x28   :  { %3090 = dma.done.wait [#allocation6], 24576  }
  0x29   :  { %3091 = vsyncadd [#allocation6], 4294942720  ;;  %v2830_v0 = vld [vmem:[#allocation5 + $0x40] sm:$0xff]   ;;  %v2834_v4 = vld [vmem:[#allocation5 + $0x48] sm:$0xff]   ;;  %vm2257_vm0 = vcmask 80896  }
  0x2a   :  { %v2831_v1 = vld [vmem:[#allocation5 + $0xc0] sm:$0xff]   ;;  %2472 = vmatprep.subr.bf16.mxu0 %v2830_v0  ;;  %v2835_v5 = vld [vmem:[#allocation5 + $0xc8] sm:$0xff]   ;;  %v2838_v8 = vld [vmem:[#allocation5 + $0x50] sm:$0xff]  }
  0x2b   :  { %v2832_v2 = vld [vmem:[#allocation5] sm:$0xff]   ;;  %2494 = vmatprep.subr.bf16.mxu1 %v2831_v1  ;;  %v2836_v6 = vld [vmem:[#allocation5 + $0x8] sm:$0xff]   ;;  %v2839_v9 = vld [vmem:[#allocation5 + $0xd0] sm:$0xff]  }
  0x2c   :  { %v2833_v3 = vld [vmem:[#allocation5 + $0x80] sm:$0xff]   ;;  %2473 = vmatpush3.bf16.msra.mxu0 %v2832_v2  ;;  %v2837_v7 = vld [vmem:[#allocation5 + $0x88] sm:$0xff]   ;;  %v2840_v10 = vld [vmem:[#allocation5 + $0x10] sm:$0xff]  }
  0x2d   :  { %2495 = vmatpush3.bf16.msra.mxu1 %v2833_v3  ;;  %2474 = vmatprep.subr.bf16.mxu0 %v2834_v4  ;;  %v2841_v11 = vld [vmem:[#allocation5 + $0x90] sm:$0xff]   ;;  %v2842_v12 = vld [vmem:[#allocation5 + $0x58] sm:$0xff]   ;;  %v2846_v16 = vld [vmem:[#allocation5 + $0x60] sm:$0xff]  }
  0x2e   :  { %2496 = vmatprep.subr.bf16.mxu1 %v2835_v5  ;;  %v2843_v13 = vld [vmem:[#allocation5 + $0xd8] sm:$0xff]   ;;  %v2847_v17 = vld [vmem:[#allocation5 + $0xe0] sm:$0xff]   ;;  %v2850_v20 = vld [vmem:[#allocation5 + $0x68] sm:$0xff]  }
  0x2f   :  { %v2844_v14 = vld [vmem:[#allocation5 + $0x18] sm:$0xff]   ;;  %v2848_v18 = vld [vmem:[#allocation5 + $0x20] sm:$0xff]   ;;  %v2851_v21 = vld [vmem:[#allocation5 + $0xe8] sm:$0xff]  }
  0x30   :  { %2475 = vmatpush3.bf16.msra.mxu0 %v2836_v6  ;;  %v2845_v15 = vld [vmem:[#allocation5 + $0x98] sm:$0xff]   ;;  %v2849_v19 = vld [vmem:[#allocation5 + $0xa0] sm:$0xff]   ;;  %v2852_v22 = vld [vmem:[#allocation5 + $0x28] sm:$0xff]  }
  0x31   :  { %2497 = vmatpush3.bf16.msra.mxu1 %v2837_v7  ;;  %2476 = vmatprep.subr.bf16.mxu0 %v2838_v8  ;;  %v2853_v23 = vld [vmem:[#allocation5 + $0xa8] sm:$0xff]   ;;  %v2854_v24 = vld [vmem:[#allocation5 + $0x70] sm:$0xff]   ;;  %v2858_v28 = vld [vmem:[#allocation5 + $0x78] sm:$0xff]  }
  0x32   :  { %2498 = vmatprep.subr.bf16.mxu1 %v2839_v9  ;;  %v2855_v25 = vld [vmem:[#allocation5 + $0xf0] sm:$0xff]   ;;  %v2859_v29 = vld [vmem:[#allocation5 + $0xf8] sm:$0xff]   ;;  %v51_v32 = vld [vmem:[#allocation2 + $0x8] sm:$0xff] }
  0x33   :  { %v2856_v26 = vld [vmem:[#allocation5 + $0x30] sm:$0xff]   ;;  %v2860_v30 = vld [vmem:[#allocation5 + $0x38] sm:$0xff]   ;;  %v75_v33 = vld [vmem:[#allocation2 + $0xc8] sm:$0xff] }
  0x34   :  { %2477 = vmatpush3.bf16.msra.mxu0 %v2840_v10  ;;  %v2857_v27 = vld [vmem:[#allocation5 + $0xb0] sm:$0xff]   ;;  %v2861_v31 = vld [vmem:[#allocation5 + $0xb8] sm:$0xff]   ;;  %v99_v35 = vpack.c.bf16 %v75_v33, %v51_v32  ;;  %v50_v37 = vld [vmem:[#allocation2] sm:$0xff] }
  0x35   :  { %2499 = vmatpush3.bf16.msra.mxu1 %v2841_v11  ;;  %2478 = vmatprep.subr.bf16.mxu0 %v2842_v12  ;;  %v53_v34 = vld [vmem:[#allocation2 + $0x18] sm:$0xff]  ;;  %v74_v38 = vld [vmem:[#allocation2 + $0xc0] sm:$0xff]  ;;  %v52_v41 = vld [vmem:[#allocation2 + $0x10] sm:$0xff] }
  0x36   :  { %2500 = vmatprep.subr.bf16.mxu1 %v2843_v13  ;;  %v77_v36 = vld [vmem:[#allocation2 + $0xd8] sm:$0xff]  ;;  %v98_v40 = vpack.c.bf16 %v74_v38, %v50_v37  ;;  %v76_v42 = vld [vmem:[#allocation2 + $0xd0] sm:$0xff]  ;;  %1697 = vmatprep.mubr.bf16.mxu0 %v99_v35  ;;  %v2862_v44 = vld [vmem:[#allocation5 + $0x140] sm:$0xff]  }
  0x37   :  { %v101_v39 = vpack.c.bf16 %v77_v36, %v53_v34  ;;  %v100_v43 = vpack.c.bf16 %v76_v42, %v52_v41  ;;  %v2863_v45 = vld [vmem:[#allocation5 + $0x1c0] sm:$0xff]   ;;  %v2866_v48 = vld [vmem:[#allocation5 + $0x148] sm:$0xff]   ;;  %v2870_v52 = vld [vmem:[#allocation5 + $0x150] sm:$0xff]  }
  0x38   :  { %2479 = vmatpush3.bf16.msra.mxu0 %v2844_v14  ;;  %v2864_v46 = vld [vmem:[#allocation5 + $0x100] sm:$0xff]   ;;  %v2867_v49 = vld [vmem:[#allocation5 + $0x1c8] sm:$0xff]   ;;  %v2871_v53 = vld [vmem:[#allocation5 + $0x1d0] sm:$0xff]  }
  0x39   :  { %2501 = vmatpush3.bf16.msra.mxu1 %v2845_v15  ;;  %2480 = vmatprep.subr.bf16.mxu0 %v2846_v16  ;;  %v2865_v47 = vld [vmem:[#allocation5 + $0x180] sm:$0xff]   ;;  %v2868_v50 = vld [vmem:[#allocation5 + $0x108] sm:$0xff]   ;;  %v2872_v54 = vld [vmem:[#allocation5 + $0x110] sm:$0xff]  }
  0x3a   :  { %2502 = vmatprep.subr.bf16.mxu1 %v2847_v17  ;;  %1738 = vmatprep.mubr.bf16.mxu1 %v101_v39  ;;  %v2869_v51 = vld [vmem:[#allocation5 + $0x188] sm:$0xff]   ;;  %v2873_v55 = vld [vmem:[#allocation5 + $0x190] sm:$0xff]   ;;  %v2874_v56 = vld [vmem:[#allocation5 + $0x158] sm:$0xff]  }
  0x3b   :  { %v2875_v57 = vld [vmem:[#allocation5 + $0x1d8] sm:$0xff]   ;;  %v2878_v60 = vld [vmem:[#allocation5 + $0x160] sm:$0xff]   ;;  %v2882_v0 = vld [vmem:[#allocation5 + $0x168] sm:$0xff]  }
  0x3c   :  { %2481 = vmatpush3.bf16.msra.mxu0 %v2848_v18  ;;  %v2876_v58 = vld [vmem:[#allocation5 + $0x118] sm:$0xff]   ;;  %v2879_v61 = vld [vmem:[#allocation5 + $0x1e0] sm:$0xff]   ;;  %v2883_v1 = vld [vmem:[#allocation5 + $0x1e8] sm:$0xff]  }
  0x3d   :  { %2503 = vmatpush3.bf16.msra.mxu1 %v2849_v19  ;;  %2482 = vmatprep.subr.bf16.mxu0 %v2850_v20  ;;  %v2877_v59 = vld [vmem:[#allocation5 + $0x198] sm:$0xff]   ;;  %v2880_v62 = vld [vmem:[#allocation5 + $0x120] sm:$0xff]   ;;  %v2884_v2 = vld [vmem:[#allocation5 + $0x128] sm:$0xff]  }
  0x3e   :  { %2504 = vmatprep.subr.bf16.mxu1 %v2851_v21  ;;  %v2881_v63 = vld [vmem:[#allocation5 + $0x1a0] sm:$0xff]   ;;  %v2885_v3 = vld [vmem:[#allocation5 + $0x1a8] sm:$0xff]   ;;  %v2886_v4 = vld [vmem:[#allocation5 + $0x170] sm:$0xff]  }
  0x3f   :  { %v2887_v5 = vld [vmem:[#allocation5 + $0x1f0] sm:$0xff]   ;;  %v2890_v8 = vld [vmem:[#allocation5 + $0x178] sm:$0xff]   ;;  %v55_v12 = vld [vmem:[#allocation2 + $0x28] sm:$0xff] }
  0x40   :  { %2483 = vmatpush3.bf16.msra.mxu0 %v2852_v22  ;;  %v2888_v6 = vld [vmem:[#allocation5 + $0x130] sm:$0xff]   ;;  %v2891_v9 = vld [vmem:[#allocation5 + $0x1f8] sm:$0xff]   ;;  %v79_v13 = vld [vmem:[#allocation2 + $0xe8] sm:$0xff] }
  0x41   :  { %2505 = vmatpush3.bf16.msra.mxu1 %v2853_v23  ;;  %2484 = vmatprep.subr.bf16.mxu0 %v2854_v24  ;;  %v2889_v7 = vld [vmem:[#allocation5 + $0x1b0] sm:$0xff]   ;;  %v2892_v10 = vld [vmem:[#allocation5 + $0x138] sm:$0xff]   ;;  %v103_v16 = vpack.c.bf16 %v79_v13, %v55_v12  ;;  %v54_v18 = vld [vmem:[#allocation2 + $0x20] sm:$0xff] }
  0x42   :  { %2506 = vmatprep.subr.bf16.mxu1 %v2855_v25  ;;  %v2893_v11 = vld [vmem:[#allocation5 + $0x1b8] sm:$0xff]   ;;  %v78_v19 = vld [vmem:[#allocation2 + $0xe0] sm:$0xff]  ;;  %v56_v20 = vld [vmem:[#allocation2 + $0x30] sm:$0xff] }
  0x43   :  { %v57_v14 = vld [vmem:[#allocation2 + $0x38] sm:$0xff]  ;;  %v102_v21 = vpack.c.bf16 %v78_v19, %v54_v18  ;;  %v80_v22 = vld [vmem:[#allocation2 + $0xf0] sm:$0xff]  ;;  %v2894_v24 = vld [vmem:[#allocation5 + $0x240] sm:$0xff]  }
  0x44   :  { %2485 = vmatpush3.bf16.msra.mxu0 %v2856_v26  ;;  %v81_v15 = vld [vmem:[#allocation2 + $0xf8] sm:$0xff]  ;;  %v104_v23 = vpack.c.bf16 %v80_v22, %v56_v20  ;;  %v2895_v25 = vld [vmem:[#allocation5 + $0x2c0] sm:$0xff]   ;;  %v2902_v32 = vld [vmem:[#allocation5 + $0x250] sm:$0xff]  }
  0x45   :  { %2507 = vmatpush3.bf16.msra.mxu1 %v2857_v27  ;;  %2486 = vmatprep.subr.bf16.mxu0 %v2858_v28  ;;  %v105_v17 = vpack.c.bf16 %v81_v15, %v57_v14  ;;  %v2896_v26 = vld [vmem:[#allocation5 + $0x200] sm:$0xff]   ;;  %v2898_v28 = vld [vmem:[#allocation5 + $0x248] sm:$0xff]   ;;  %v2903_v33 = vld [vmem:[#allocation5 + $0x2d0] sm:$0xff]  }
  0x46   :  { %2508 = vmatprep.subr.bf16.mxu1 %v2859_v29  ;;  %v2897_v27 = vld [vmem:[#allocation5 + $0x280] sm:$0xff]   ;;  %v2899_v29 = vld [vmem:[#allocation5 + $0x2c8] sm:$0xff]   ;;  %v2904_v34 = vld [vmem:[#allocation5 + $0x210] sm:$0xff]  }
  0x47   :  { %v2905_v35 = vld [vmem:[#allocation5 + $0x290] sm:$0xff]   ;;  %v2906_v36 = vld [vmem:[#allocation5 + $0x258] sm:$0xff]   ;;  %v2911_v41 = vld [vmem:[#allocation5 + $0x2e0] sm:$0xff]  }
  0x48   :  { %2487 = vmatpush3.bf16.msra.mxu0 %v2860_v30  ;;  %v2900_v30 = vld [vmem:[#allocation5 + $0x208] sm:$0xff]   ;;  %v2907_v37 = vld [vmem:[#allocation5 + $0x2d8] sm:$0xff]   ;;  %v2912_v42 = vld [vmem:[#allocation5 + $0x220] sm:$0xff]  }
  0x49   :  { %2509 = vmatpush3.bf16.msra.mxu1 %v2861_v31  ;;  %2516 = vmatprep.subr.bf16.mxu0 %v2862_v44  ;;  %v2901_v31 = vld [vmem:[#allocation5 + $0x288] sm:$0xff]   ;;  %v2908_v38 = vld [vmem:[#allocation5 + $0x218] sm:$0xff]   ;;  %v2934_v12 = vld [vmem:[#allocation5 + $0x350] sm:$0xff]  }
  0x4a   :  { %2538 = vmatprep.subr.bf16.mxu1 %v2863_v45  ;;  %v2909_v39 = vld [vmem:[#allocation5 + $0x298] sm:$0xff]   ;;  %v2914_v44 = vld [vmem:[#allocation5 + $0x268] sm:$0xff]   ;;  %v2935_v13 = vld [vmem:[#allocation5 + $0x3d0] sm:$0xff]  }
  0x4b   :  { %1698 = vmatmul.mubr.bf16.vlgmr.msra.gmra.mrb[0].mxu0 %v98_v40  ;;  %v2910_v40 = vld [vmem:[#allocation5 + $0x260] sm:$0xff]   ;;  %v2915_v45 = vld [vmem:[#allocation5 + $0x2e8] sm:$0xff]   ;;  %v2936_v14 = vld [vmem:[#allocation5 + $0x310] sm:$0xff]  }
  0x4c   :  { %1739 = vmatmul.mubr.bf16.vlgmr.msra.gmra.mrb[0].mxu1 %v100_v43  ;;  %2517 = vmatpush3.bf16.msra.mxu0 %v2864_v46  ;;  %v2913_v43 = vld [vmem:[#allocation5 + $0x2a0] sm:$0xff]   ;;  %v2916_v46 = vld [vmem:[#allocation5 + $0x228] sm:$0xff]   ;;  %v2937_v15 = vld [vmem:[#allocation5 + $0x390] sm:$0xff]  }
  0x4d   :  { %2539 = vmatpush3.bf16.msra.mxu1 %v2865_v47  ;;  %2518 = vmatprep.subr.bf16.mxu0 %v2866_v48  ;;  %v2917_v47 = vld [vmem:[#allocation5 + $0x2a8] sm:$0xff]   ;;  %v2918_v48 = vld [vmem:[#allocation5 + $0x270] sm:$0xff]   ;;  %v2940_v18 = vld [vmem:[#allocation5 + $0x318] sm:$0xff]  }
  0x4e   :  { %2540 = vmatprep.subr.bf16.mxu1 %v2867_v49  ;;  %1779 = vmatprep.mubr.bf16.mxu0 %v103_v16  ;;  %v2919_v49 = vld [vmem:[#allocation5 + $0x2f0] sm:$0xff]   ;;  %v2938_v16 = vld [vmem:[#allocation5 + $0x358] sm:$0xff]   ;;  %v2942_v20 = vld [vmem:[#allocation5 + $0x360] sm:$0xff]  }
  0x4f   :  { %1820 = vmatprep.mubr.bf16.mxu1 %v105_v17  ;;  %v2939_v17 = vld [vmem:[#allocation5 + $0x3d8] sm:$0xff]   ;;  %v2944_v22 = vld [vmem:[#allocation5 + $0x320] sm:$0xff]  }
  0x50   :  { %2519 = vmatpush3.bf16.msra.mxu0 %v2868_v50  ;;  %v2920_v50 = vld [vmem:[#allocation5 + $0x230] sm:$0xff]   ;;  %v2941_v19 = vld [vmem:[#allocation5 + $0x398] sm:$0xff]  }
  0x51   :  { %2541 = vmatpush3.bf16.msra.mxu1 %v2869_v51  ;;  %2520 = vmatprep.subr.bf16.mxu0 %v2870_v52  ;;  %v2921_v51 = vld [vmem:[#allocation5 + $0x2b0] sm:$0xff]   ;;  %v2922_v52 = vld [vmem:[#allocation5 + $0x278] sm:$0xff]  }
  0x52   :  { %2542 = vmatprep.subr.bf16.mxu1 %v2871_v53  ;;  %v2923_v53 = vld [vmem:[#allocation5 + $0x2f8] sm:$0xff]  }
  0x54   :  { %2521 = vmatpush3.bf16.msra.mxu0 %v2872_v54  ;;  %v2924_v54 = vld [vmem:[#allocation5 + $0x238] sm:$0xff]  }
  0x55   :  { %2543 = vmatpush3.bf16.msra.mxu1 %v2873_v55  ;;  %2522 = vmatprep.subr.bf16.mxu0 %v2874_v56  ;;  %v2925_v55 = vld [vmem:[#allocation5 + $0x2b8] sm:$0xff]   ;;  %v59_v56 = vld [vmem:[#allocation2 + $0x48] sm:$0xff] }
  0x56   :  { %2544 = vmatprep.subr.bf16.mxu1 %v2875_v57  ;;  %v83_v57 = vld [vmem:[#allocation2 + $0x108] sm:$0xff] }
  0x58   :  { %2523 = vmatpush3.bf16.msra.mxu0 %v2876_v58  ;;  %v107_v58 = vpack.c.bf16 %v83_v57, %v59_v56  ;;  %v2966_v56 = vld [vmem:[#allocation5 + $0x450] sm:$0xff]  }
  0x59   :  { %2545 = vmatpush3.bf16.msra.mxu1 %v2877_v59  ;;  %2524 = vmatprep.subr.bf16.mxu0 %v2878_v60  ;;  %v61_v59 = vld [vmem:[#allocation2 + $0x58] sm:$0xff]  ;;  %v2967_v57 = vld [vmem:[#allocation5 + $0x4d0] sm:$0xff]  }
  0x5a   :  { %2546 = vmatprep.subr.bf16.mxu1 %v2879_v61  ;;  %v85_v60 = vld [vmem:[#allocation2 + $0x118] sm:$0xff]  ;;  %v58_v61 = vld [vmem:[#allocation2 + $0x40] sm:$0xff] }
  0x5c   :  { %2525 = vmatpush3.bf16.msra.mxu0 %v2880_v62  ;;  %v109_v62 = vpack.c.bf16 %v85_v60, %v61_v59  ;;  %v2969_v59 = vld [vmem:[#allocation5 + $0x490] sm:$0xff]   ;;  %v2970_v60 = vld [vmem:[#allocation5 + $0x458] sm:$0xff]  }
  0x5d   :  { %2547 = vmatpush3.bf16.msra.mxu1 %v2881_v63  ;;  %2526 = vmatprep.subr.bf16.mxu0 %v2882_v0  ;;  %v82_v63 = vld [vmem:[#allocation2 + $0x100] sm:$0xff]  ;;  %v60_v0 = vld [vmem:[#allocation2 + $0x50] sm:$0xff] }
  0x5e   :  { %2548 = vmatprep.subr.bf16.mxu1 %v2883_v1  ;;  %v84_v1 = vld [vmem:[#allocation2 + $0x110] sm:$0xff] }
  0x60   :  { %2527 = vmatpush3.bf16.msra.mxu0 %v2884_v2  ;;  %v106_v2 = vpack.c.bf16 %v82_v63, %v58_v61  ;;  %v2971_v61 = vld [vmem:[#allocation5 + $0x4d8] sm:$0xff]  }
  0x61   :  { %2549 = vmatpush3.bf16.msra.mxu1 %v2885_v3  ;;  %2528 = vmatprep.subr.bf16.mxu0 %v2886_v4  ;;  %v108_v3 = vpack.c.bf16 %v84_v1, %v60_v0  ;;  %v2926_v4 = vld [vmem:[#allocation5 + $0x340] sm:$0xff]   ;;  %v2973_v63 = vld [vmem:[#allocation5 + $0x498] sm:$0xff]  }
  0x62   :  { %2550 = vmatprep.subr.bf16.mxu1 %v2887_v5  ;;  %v2927_v5 = vld [vmem:[#allocation5 + $0x3c0] sm:$0xff]  }
  0x63   :  { %v2974_v0 = vld [vmem:[#allocation5 + $0x460] sm:$0xff]  }
  0x64   :  { %2529 = vmatpush3.bf16.msra.mxu0 %v2888_v6  ;;  %v2928_v6 = vld [vmem:[#allocation5 + $0x300] sm:$0xff]  }
  0x65   :  { %2551 = vmatpush3.bf16.msra.mxu1 %v2889_v7  ;;  %2530 = vmatprep.subr.bf16.mxu0 %v2890_v8  ;;  %v2929_v7 = vld [vmem:[#allocation5 + $0x380] sm:$0xff]   ;;  %v2930_v8 = vld [vmem:[#allocation5 + $0x348] sm:$0xff]  }
  0x66   :  { %2552 = vmatprep.subr.bf16.mxu1 %v2891_v9  ;;  %v2931_v9 = vld [vmem:[#allocation5 + $0x3c8] sm:$0xff]   ;;  %v2975_v1 = vld [vmem:[#allocation5 + $0x4e0] sm:$0xff]  }
  0x68   :  { %2531 = vmatpush3.bf16.msra.mxu0 %v2892_v10  ;;  %v2932_v10 = vld [vmem:[#allocation5 + $0x308] sm:$0xff]  }
  0x69   :  { %2553 = vmatpush3.bf16.msra.mxu1 %v2893_v11  ;;  %2560 = vmatprep.subr.bf16.mxu0 %v2894_v24  ;;  %v2933_v11 = vld [vmem:[#allocation5 + $0x388] sm:$0xff]  }
  0x6a   :  { %2582 = vmatprep.subr.bf16.mxu1 %v2895_v25  ;;  %v2946_v24 = vld [vmem:[#allocation5 + $0x368] sm:$0xff]  }
  0x6b   :  { %1780 = vmatmul.mubr.bf16.vlgmr.msra.gmra.mrb[4].mxu0 %v102_v21  ;;  %v2943_v21 = vld [vmem:[#allocation5 + $0x3e0] sm:$0xff]   ;;  %v2947_v25 = vld [vmem:[#allocation5 + $0x3e8] sm:$0xff]  }
  0x6c   :  { %1821 = vmatmul.mubr.bf16.vlgmr.msra.gmra.mrb[4].mxu1 %v104_v23  ;;  %2561 = vmatpush3.bf16.msra.mxu0 %v2896_v26  ;;  %v2945_v23 = vld [vmem:[#allocation5 + $0x3a0] sm:$0xff]   ;;  %v2948_v26 = vld [vmem:[#allocation5 + $0x328] sm:$0xff]  }
  0x6d   :  { %2583 = vmatpush3.bf16.msra.mxu1 %v2897_v27  ;;  %2562 = vmatprep.subr.bf16.mxu0 %v2898_v28  ;;  %v2949_v27 = vld [vmem:[#allocation5 + $0x3a8] sm:$0xff]   ;;  %v2950_v28 = vld [vmem:[#allocation5 + $0x370] sm:$0xff]  }
  0x6e   :  { %2584 = vmatprep.subr.bf16.mxu1 %v2899_v29  ;;  %1861 = vmatprep.mubr.bf16.mxu0 %v107_v58  ;;  %v2951_v29 = vld [vmem:[#allocation5 + $0x3f0] sm:$0xff]  }
  0x6f   :  { %1902 = vmatprep.mubr.bf16.mxu1 %v109_v62  ;;  %v2968_v58 = vld [vmem:[#allocation5 + $0x410] sm:$0xff]   ;;  %v2972_v62 = vld [vmem:[#allocation5 + $0x418] sm:$0xff]  }
  0x70   :  { %2563 = vmatpush3.bf16.msra.mxu0 %v2900_v30  ;;  %v2952_v30 = vld [vmem:[#allocation5 + $0x330] sm:$0xff]  }
  0x71   :  { %2585 = vmatpush3.bf16.msra.mxu1 %v2901_v31  ;;  %2564 = vmatprep.subr.bf16.mxu0 %v2902_v32  ;;  %v2953_v31 = vld [vmem:[#allocation5 + $0x3b0] sm:$0xff]   ;;  %v2954_v32 = vld [vmem:[#allocation5 + $0x378] sm:$0xff]  }
  0x72   :  { %2586 = vmatprep.subr.bf16.mxu1 %v2903_v33  ;;  %v2955_v33 = vld [vmem:[#allocation5 + $0x3f8] sm:$0xff]  }
  0x74   :  { %2565 = vmatpush3.bf16.msra.mxu0 %v2904_v34  ;;  %v2956_v34 = vld [vmem:[#allocation5 + $0x338] sm:$0xff]  }
  0x75   :  { %2587 = vmatpush3.bf16.msra.mxu1 %v2905_v35  ;;  %2566 = vmatprep.subr.bf16.mxu0 %v2906_v36  ;;  %v2957_v35 = vld [vmem:[#allocation5 + $0x3b8] sm:$0xff]   ;;  %v63_v36 = vld [vmem:[#allocation2 + $0x68] sm:$0xff] }
  0x76   :  { %2588 = vmatprep.subr.bf16.mxu1 %v2907_v37  ;;  %v87_v37 = vld [vmem:[#allocation2 + $0x128] sm:$0xff] }
  0x78   :  { %2567 = vmatpush3.bf16.msra.mxu0 %v2908_v38  ;;  %v65_v38 = vld [vmem:[#allocation2 + $0x78] sm:$0xff] }
  0x79   :  { %2589 = vmatpush3.bf16.msra.mxu1 %v2909_v39  ;;  %2568 = vmatprep.subr.bf16.mxu0 %v2910_v40  ;;  %v111_v39 = vpack.c.bf16 %v87_v37, %v63_v36  ;;  %v89_v40 = vld [vmem:[#allocation2 + $0x138] sm:$0xff]  ;;  %v2998_v36 = vld [vmem:[#allocation5 + $0x550] sm:$0xff]  }
  0x7a   :  { %2590 = vmatprep.subr.bf16.mxu1 %v2911_v41  ;;  %v62_v41 = vld [vmem:[#allocation2 + $0x60] sm:$0xff]  ;;  %v2999_v37 = vld [vmem:[#allocation5 + $0x5d0] sm:$0xff]  }
  0x7c   :  { %2569 = vmatpush3.bf16.msra.mxu0 %v2912_v42  ;;  %v86_v42 = vld [vmem:[#allocation2 + $0x120] sm:$0xff] }
  0x7d   :  { %2591 = vmatpush3.bf16.msra.mxu1 %v2913_v43  ;;  %2570 = vmatprep.subr.bf16.mxu0 %v2914_v44  ;;  %v113_v43 = vpack.c.bf16 %v89_v40, %v65_v38  ;;  %v110_v44 = vpack.c.bf16 %v86_v42, %v62_v41  ;;  %v3000_v38 = vld [vmem:[#allocation5 + $0x510] sm:$0xff]   ;;  %v3002_v40 = vld [vmem:[#allocation5 + $0x558] sm:$0xff]  }
  0x7e   :  { %2592 = vmatprep.subr.bf16.mxu1 %v2915_v45  ;;  %v64_v45 = vld [vmem:[#allocation2 + $0x70] sm:$0xff]  ;;  %v3003_v41 = vld [vmem:[#allocation5 + $0x5d8] sm:$0xff]  }
  0x7f   :  { %v3004_v42 = vld [vmem:[#allocation5 + $0x518] sm:$0xff]  }
  0x80   :  { %2571 = vmatpush3.bf16.msra.mxu0 %v2916_v46  ;;  %v88_v46 = vld [vmem:[#allocation2 + $0x130] sm:$0xff] }
  0x81   :  { %2593 = vmatpush3.bf16.msra.mxu1 %v2917_v47  ;;  %2572 = vmatprep.subr.bf16.mxu0 %v2918_v48  ;;  %v112_v47 = vpack.c.bf16 %v88_v46, %v64_v45  ;;  %v2958_v48 = vld [vmem:[#allocation5 + $0x440] sm:$0xff]  }
  0x82   :  { %2594 = vmatprep.subr.bf16.mxu1 %v2919_v49  ;;  %v2959_v49 = vld [vmem:[#allocation5 + $0x4c0] sm:$0xff]  }
  0x83   :  { %v3007_v45 = vld [vmem:[#allocation5 + $0x5e0] sm:$0xff]  }
  0x84   :  { %2573 = vmatpush3.bf16.msra.mxu0 %v2920_v50  ;;  %v2960_v50 = vld [vmem:[#allocation5 + $0x400] sm:$0xff]  }
  0x85   :  { %2595 = vmatpush3.bf16.msra.mxu1 %v2921_v51  ;;  %2574 = vmatprep.subr.bf16.mxu0 %v2922_v52  ;;  %v2961_v51 = vld [vmem:[#allocation5 + $0x480] sm:$0xff]   ;;  %v2962_v52 = vld [vmem:[#allocation5 + $0x448] sm:$0xff]  }
  0x86   :  { %2596 = vmatprep.subr.bf16.mxu1 %v2923_v53  ;;  %v2963_v53 = vld [vmem:[#allocation5 + $0x4c8] sm:$0xff]   ;;  %v3008_v46 = vld [vmem:[#allocation5 + $0x520] sm:$0xff]  }
  0x88   :  { %2575 = vmatpush3.bf16.msra.mxu0 %v2924_v54  ;;  %v2964_v54 = vld [vmem:[#allocation5 + $0x408] sm:$0xff]  }
  0x89   :  { %2597 = vmatpush3.bf16.msra.mxu1 %v2925_v55  ;;  %2604 = vmatprep.subr.bf16.mxu0 %v2926_v4  ;;  %v2965_v55 = vld [vmem:[#allocation5 + $0x488] sm:$0xff]  }
  0x8a   :  { %2626 = vmatprep.subr.bf16.mxu1 %v2927_v5  ;;  %v2978_v4 = vld [vmem:[#allocation5 + $0x468] sm:$0xff]  }
  0x8b   :  { %1862 = vmatmul.mubr.bf16.vlgmr.msra.gmra.mrb[8].mxu0 %v106_v2  ;;  %v2976_v2 = vld [vmem:[#allocation5 + $0x420] sm:$0xff]   ;;  %v2979_v5 = vld [vmem:[#allocation5 + $0x4e8] sm:$0xff]  }
  0x8c   :  { %1903 = vmatmul.mubr.bf16.vlgmr.msra.gmra.mrb[8].mxu1 %v108_v3  ;;  %2605 = vmatpush3.bf16.msra.mxu0 %v2928_v6  ;;  %v2977_v3 = vld [vmem:[#allocation5 + $0x4a0] sm:$0xff]   ;;  %v2980_v6 = vld [vmem:[#allocation5 + $0x428] sm:$0xff]  }
  0x8d   :  { %2627 = vmatpush3.bf16.msra.mxu1 %v2929_v7  ;;  %2606 = vmatprep.subr.bf16.mxu0 %v2930_v8  ;;  %v2981_v7 = vld [vmem:[#allocation5 + $0x4a8] sm:$0xff]   ;;  %v2982_v8 = vld [vmem:[#allocation5 + $0x470] sm:$0xff]  }
  0x8e   :  { %2628 = vmatprep.subr.bf16.mxu1 %v2931_v9  ;;  %1943 = vmatprep.mubr.bf16.mxu0 %v111_v39  ;;  %v2983_v9 = vld [vmem:[#allocation5 + $0x4f0] sm:$0xff]  }
  0x8f   :  { %1984 = vmatprep.mubr.bf16.mxu1 %v113_v43  ;;  %v3001_v39 = vld [vmem:[#allocation5 + $0x590] sm:$0xff]   ;;  %v3005_v43 = vld [vmem:[#allocation5 + $0x598] sm:$0xff]  }
  0x90   :  { %2607 = vmatpush3.bf16.msra.mxu0 %v2932_v10  ;;  %v2984_v10 = vld [vmem:[#allocation5 + $0x430] sm:$0xff]  }
  0x91   :  { %2629 = vmatpush3.bf16.msra.mxu1 %v2933_v11  ;;  %2608 = vmatprep.subr.bf16.mxu0 %v2934_v12  ;;  %v2985_v11 = vld [vmem:[#allocation5 + $0x4b0] sm:$0xff]   ;;  %v2986_v12 = vld [vmem:[#allocation5 + $0x478] sm:$0xff]  }
  0x92   :  { %2630 = vmatprep.subr.bf16.mxu1 %v2935_v13  ;;  %v2987_v13 = vld [vmem:[#allocation5 + $0x4f8] sm:$0xff]  }
  0x94   :  { %2609 = vmatpush3.bf16.msra.mxu0 %v2936_v14  ;;  %v2988_v14 = vld [vmem:[#allocation5 + $0x438] sm:$0xff]  }
  0x95   :  { %2631 = vmatpush3.bf16.msra.mxu1 %v2937_v15  ;;  %2610 = vmatprep.subr.bf16.mxu0 %v2938_v16  ;;  %v2989_v15 = vld [vmem:[#allocation5 + $0x4b8] sm:$0xff]   ;;  %v67_v16 = vld [vmem:[#allocation2 + $0x88] sm:$0xff] }
  0x96   :  { %2632 = vmatprep.subr.bf16.mxu1 %v2939_v17  ;;  %v91_v17 = vld [vmem:[#allocation2 + $0x148] sm:$0xff] }
  0x98   :  { %2611 = vmatpush3.bf16.msra.mxu0 %v2940_v18  ;;  %v69_v18 = vld [vmem:[#allocation2 + $0x98] sm:$0xff] }
  0x99   :  { %2633 = vmatpush3.bf16.msra.mxu1 %v2941_v19  ;;  %2612 = vmatprep.subr.bf16.mxu0 %v2942_v20  ;;  %v93_v19 = vld [vmem:[#allocation2 + $0x158] sm:$0xff]  ;;  %v115_v20 = vpack.c.bf16 %v91_v17, %v67_v16 }
  0x9a   :  { %2634 = vmatprep.subr.bf16.mxu1 %v2943_v21  ;;  %v117_v21 = vpack.c.bf16 %v93_v19, %v69_v18 }
  0x9c   :  { %2613 = vmatpush3.bf16.msra.mxu0 %v2944_v22  ;;  %v66_v22 = vld [vmem:[#allocation2 + $0x80] sm:$0xff] }
  0x9d   :  { %2635 = vmatpush3.bf16.msra.mxu1 %v2945_v23  ;;  %2614 = vmatprep.subr.bf16.mxu0 %v2946_v24  ;;  %v90_v23 = vld [vmem:[#allocation2 + $0x140] sm:$0xff]  ;;  %v68_v24 = vld [vmem:[#allocation2 + $0x90] sm:$0xff] }
  0x9e   :  { %2636 = vmatprep.subr.bf16.mxu1 %v2947_v25  ;;  %v114_v25 = vpack.c.bf16 %v90_v23, %v66_v22 }
  0xa0   :  { %2615 = vmatpush3.bf16.msra.mxu0 %v2948_v26  ;;  %v92_v26 = vld [vmem:[#allocation2 + $0x150] sm:$0xff] }
  0xa1   :  { %2637 = vmatpush3.bf16.msra.mxu1 %v2949_v27  ;;  %2616 = vmatprep.subr.bf16.mxu0 %v2950_v28  ;;  %v116_v27 = vpack.c.bf16 %v92_v26, %v68_v24  ;;  %v2990_v28 = vld [vmem:[#allocation5 + $0x540] sm:$0xff]   ;;  %v2160_v26 = vld [vmem:[%s3226_s3 + $0x8] sm:$0xff] }
  0xa2   :  { %2638 = vmatprep.subr.bf16.mxu1 %v2951_v29  ;;  %v2991_v29 = vld [vmem:[#allocation5 + $0x5c0] sm:$0xff]  }
  0xa4   :  { %2617 = vmatpush3.bf16.msra.mxu0 %v2952_v30  ;;  %v2992_v30 = vld [vmem:[#allocation5 + $0x500] sm:$0xff]  }
  0xa5   :  { %2639 = vmatpush3.bf16.msra.mxu1 %v2953_v31  ;;  %2618 = vmatprep.subr.bf16.mxu0 %v2954_v32  ;;  %v2993_v31 = vld [vmem:[#allocation5 + $0x580] sm:$0xff]   ;;  %v2994_v32 = vld [vmem:[#allocation5 + $0x548] sm:$0xff]  }
  0xa6   :  { %2640 = vmatprep.subr.bf16.mxu1 %v2955_v33  ;;  %v2995_v33 = vld [vmem:[#allocation5 + $0x5c8] sm:$0xff]  }
  0xa8   :  { %2619 = vmatpush3.bf16.msra.mxu0 %v2956_v34  ;;  %v2996_v34 = vld [vmem:[#allocation5 + $0x508] sm:$0xff]  }
  0xa9   :  { %2641 = vmatpush3.bf16.msra.mxu1 %v2957_v35  ;;  %2648 = vmatprep.subr.bf16.mxu0 %v2958_v48  ;;  %v2997_v35 = vld [vmem:[#allocation5 + $0x588] sm:$0xff]  }
  0xaa   :  { %2670 = vmatprep.subr.bf16.mxu1 %v2959_v49  ;;  %v3010_v48 = vld [vmem:[#allocation5 + $0x568] sm:$0xff]  }
  0xab   :  { %1944 = vmatmul.mubr.bf16.vlgmr.msra.gmra.mrb[12].mxu0 %v110_v44  ;;  %v3006_v44 = vld [vmem:[#allocation5 + $0x560] sm:$0xff]   ;;  %v3011_v49 = vld [vmem:[#allocation5 + $0x5e8] sm:$0xff]  }
  0xac   :  { %1985 = vmatmul.mubr.bf16.vlgmr.msra.gmra.mrb[12].mxu1 %v112_v47  ;;  %2649 = vmatpush3.bf16.msra.mxu0 %v2960_v50  ;;  %v3009_v47 = vld [vmem:[#allocation5 + $0x5a0] sm:$0xff]   ;;  %v3012_v50 = vld [vmem:[#allocation5 + $0x528] sm:$0xff]  }
  0xad   :  { %2671 = vmatpush3.bf16.msra.mxu1 %v2961_v51  ;;  %2650 = vmatprep.subr.bf16.mxu0 %v2962_v52  ;;  %v3013_v51 = vld [vmem:[#allocation5 + $0x5a8] sm:$0xff]   ;;  %v3014_v52 = vld [vmem:[#allocation5 + $0x570] sm:$0xff]  }
  0xae   :  { %2672 = vmatprep.subr.bf16.mxu1 %v2963_v53  ;;  %2025 = vmatprep.mubr.bf16.mxu0 %v115_v20  ;;  %v3015_v53 = vld [vmem:[#allocation5 + $0x5f0] sm:$0xff]  }
  0xaf   :  { %2066 = vmatprep.mubr.bf16.mxu1 %v117_v21 }
  0xb0   :  { %2651 = vmatpush3.bf16.msra.mxu0 %v2964_v54  ;;  %v3016_v54 = vld [vmem:[#allocation5 + $0x530] sm:$0xff]  }
  0xb1   :  { %2673 = vmatpush3.bf16.msra.mxu1 %v2965_v55  ;;  %2652 = vmatprep.subr.bf16.mxu0 %v2966_v56  ;;  %v3017_v55 = vld [vmem:[#allocation5 + $0x5b0] sm:$0xff]   ;;  %v3018_v56 = vld [vmem:[#allocation5 + $0x578] sm:$0xff]  }
  0xb2   :  { %2674 = vmatprep.subr.bf16.mxu1 %v2967_v57  ;;  %v3019_v57 = vld [vmem:[#allocation5 + $0x5f8] sm:$0xff]  }
  0xb4   :  { %2653 = vmatpush3.bf16.msra.mxu0 %v2968_v58  ;;  %v3020_v58 = vld [vmem:[#allocation5 + $0x538] sm:$0xff]  }
  0xb5   :  { %2675 = vmatpush3.bf16.msra.mxu1 %v2969_v59  ;;  %2654 = vmatprep.subr.bf16.mxu0 %v2970_v60  ;;  %v3021_v59 = vld [vmem:[#allocation5 + $0x5b8] sm:$0xff]   ;;  %v71_v60 = vld [vmem:[#allocation2 + $0xa8] sm:$0xff] }
  0xb6   :  { %2676 = vmatprep.subr.bf16.mxu1 %v2971_v61  ;;  %v95_v61 = vld [vmem:[#allocation2 + $0x168] sm:$0xff] }
  0xb8   :  { %2655 = vmatpush3.bf16.msra.mxu0 %v2972_v62  ;;  %v119_v62 = vpack.c.bf16 %v95_v61, %v71_v60  ;;  %v2172_v60 = vld [vmem:[%s3226_s3 + $0x68] sm:$0xff] }
  0xb9   :  { %2677 = vmatpush3.bf16.msra.mxu1 %v2973_v63  ;;  %2656 = vmatprep.subr.bf16.mxu0 %v2974_v0  ;;  %v73_v63 = vld [vmem:[#allocation2 + $0xb8] sm:$0xff] }
  0xba   :  { %2678 = vmatprep.subr.bf16.mxu1 %v2975_v1  ;;  %v97_v0 = vld [vmem:[#allocation2 + $0x178] sm:$0xff]  ;;  %v70_v1 = vld [vmem:[#allocation2 + $0xa0] sm:$0xff] }
  0xbc   :  { %2657 = vmatpush3.bf16.msra.mxu0 %v2976_v2  ;;  %v121_v2 = vpack.c.bf16 %v97_v0, %v73_v63  ;;  %v2174_v63 = vld [vmem:[%s3226_s3 + $0x78] sm:$0xff] }
  0xbd   :  { %2679 = vmatpush3.bf16.msra.mxu1 %v2977_v3  ;;  %2658 = vmatprep.subr.bf16.mxu0 %v2978_v4  ;;  %v94_v3 = vld [vmem:[#allocation2 + $0x160] sm:$0xff]  ;;  %v72_v4 = vld [vmem:[#allocation2 + $0xb0] sm:$0xff] }
  0xbe   :  { %2680 = vmatprep.subr.bf16.mxu1 %v2979_v5  ;;  %v96_v5 = vld [vmem:[#allocation2 + $0x170] sm:$0xff] }
  0xc0   :  { %2659 = vmatpush3.bf16.msra.mxu0 %v2980_v6  ;;  %v118_v6 = vpack.c.bf16 %v94_v3, %v70_v1 }
  0xc1   :  { %2681 = vmatpush3.bf16.msra.mxu1 %v2981_v7  ;;  %2660 = vmatprep.subr.bf16.mxu0 %v2982_v8  ;;  %v120_v7 = vpack.c.bf16 %v96_v5, %v72_v4 }
  0xc2   :  { %2682 = vmatprep.subr.bf16.mxu1 %v2983_v9 }
  0xc4   :  { %2661 = vmatpush3.bf16.msra.mxu0 %v2984_v10  ;;  %v2278_v10 = vld [vmem:[%s3225_s2] ss:$0 sm:$0xff] }
  0xc5   :  { %2683 = vmatpush3.bf16.msra.mxu1 %v2985_v11  ;;  %2662 = vmatprep.subr.bf16.mxu0 %v2986_v12 }
  0xc6   :  { %2684 = vmatprep.subr.bf16.mxu1 %v2987_v13 }
  0xc8   :  { %2663 = vmatpush3.bf16.msra.mxu0 %v2988_v14 }
  0xc9   :  { %2685 = vmatpush3.bf16.msra.mxu1 %v2989_v15  ;;  %2692 = vmatprep.subr.bf16.mxu0 %v2990_v28 }
  0xca   :  { %2714 = vmatprep.subr.bf16.mxu1 %v2991_v29  ;;  %v2162_v29 = vld [vmem:[%s3226_s3 + $0x18] sm:$0xff] }
  0xcb   :  { %2026 = vmatmul.mubr.bf16.vlgmr.msra.gmra.mrb[16].mxu0 %v114_v25  ;;  %v2159_v25 = vld [vmem:[%s3226_s3] sm:$0xff] }
  0xcc   :  { %2067 = vmatmul.mubr.bf16.vlgmr.msra.gmra.mrb[16].mxu1 %v116_v27  ;;  %2693 = vmatpush3.bf16.msra.mxu0 %v2992_v30  ;;  %v2161_v27 = vld [vmem:[%s3226_s3 + $0x10] sm:$0xff]  ;;  %v2789_v28 = vpack.c.bf16 %v2160_v26, %v2159_v25 }
  0xcd   :  { %2715 = vmatpush3.bf16.msra.mxu1 %v2993_v31  ;;  %2694 = vmatprep.subr.bf16.mxu0 %v2994_v32  ;;  %v2793_v30 = vpack.c.bf16 %v2162_v29, %v2161_v27  ;;  %v2163_v31 = vld [vmem:[%s3226_s3 + $0x20] sm:$0xff]  ;;  %v2164_v32 = vld [vmem:[%s3226_s3 + $0x28] sm:$0xff] }
  0xce   :  { %2716 = vmatprep.subr.bf16.mxu1 %v2995_v33  ;;  %2107 = vmatprep.mubr.bf16.mxu0 %v119_v62  ;;  %v2797_v33 = vpack.c.bf16 %v2164_v32, %v2163_v31  ;;  %v2173_v62 = vld [vmem:[%s3226_s3 + $0x70] sm:$0xff] }
  0xcf   :  { %2148 = vmatprep.mubr.bf16.mxu1 %v121_v2  ;;  %v2817_v0 = vpack.c.bf16 %v2174_v63, %v2173_v62 }
  0xd0   :  { %2695 = vmatpush3.bf16.msra.mxu0 %v2996_v34  ;;  %v2165_v34 = vld [vmem:[%s3226_s3 + $0x30] sm:$0xff] }
  0xd1   :  { %2717 = vmatpush3.bf16.msra.mxu1 %v2997_v35  ;;  %2696 = vmatprep.subr.bf16.mxu0 %v2998_v36  ;;  %v2166_v35 = vld [vmem:[%s3226_s3 + $0x38] sm:$0xff] }
  0xd2   :  { %2718 = vmatprep.subr.bf16.mxu1 %v2999_v37  ;;  %v2801_v36 = vpack.c.bf16 %v2166_v35, %v2165_v34  ;;  %v2167_v37 = vld [vmem:[%s3226_s3 + $0x40] sm:$0xff] }
  0xd4   :  { %2697 = vmatpush3.bf16.msra.mxu0 %v3000_v38  ;;  %v2168_v38 = vld [vmem:[%s3226_s3 + $0x48] sm:$0xff] }
  0xd5   :  { %2719 = vmatpush3.bf16.msra.mxu1 %v3001_v39  ;;  %2698 = vmatprep.subr.bf16.mxu0 %v3002_v40  ;;  %v2805_v39 = vpack.c.bf16 %v2168_v38, %v2167_v37 }
  0xd6   :  { %2720 = vmatprep.subr.bf16.mxu1 %v3003_v41 }
  0xd8   :  { %2699 = vmatpush3.bf16.msra.mxu0 %v3004_v42 }
  0xd9   :  { %2721 = vmatpush3.bf16.msra.mxu1 %v3005_v43  ;;  %2700 = vmatprep.subr.bf16.mxu0 %v3006_v44 }
  0xda   :  { %2722 = vmatprep.subr.bf16.mxu1 %v3007_v45 }
  0xdc   :  { %2701 = vmatpush3.bf16.msra.mxu0 %v3008_v46 }
  0xdd   :  { %2723 = vmatpush3.bf16.msra.mxu1 %v3009_v47  ;;  %2702 = vmatprep.subr.bf16.mxu0 %v3010_v48 }
  0xde   :  { %2724 = vmatprep.subr.bf16.mxu1 %v3011_v49 }
  0xe0   :  { %2703 = vmatpush3.bf16.msra.mxu0 %v3012_v50 }
  0xe1   :  { %2725 = vmatpush3.bf16.msra.mxu1 %v3013_v51  ;;  %2704 = vmatprep.subr.bf16.mxu0 %v3014_v52 }
  0xe2   :  { %2726 = vmatprep.subr.bf16.mxu1 %v3015_v53 }
  0xe4   :  { %2705 = vmatpush3.bf16.msra.mxu0 %v3016_v54 }
  0xe5   :  { %2727 = vmatpush3.bf16.msra.mxu1 %v3017_v55  ;;  %2706 = vmatprep.subr.bf16.mxu0 %v3018_v56  ;;  %v2169_v56 = vld [vmem:[%s3226_s3 + $0x50] sm:$0xff] }
  0xe6   :  { %2728 = vmatprep.subr.bf16.mxu1 %v3019_v57  ;;  %v2170_v57 = vld [vmem:[%s3226_s3 + $0x58] sm:$0xff] }
  0xe8   :  { %2707 = vmatpush3.bf16.msra.mxu0 %v3020_v58  ;;  %v2809_v58 = vpack.c.bf16 %v2170_v57, %v2169_v56 }
  0xe9   :  { %2729 = vmatpush3.bf16.msra.mxu1 %v3021_v59  ;;  %2790 = vmatprep.subr.bf16.mxu0 %v2789_v28  ;;  %v2171_v59 = vld [vmem:[%s3226_s3 + $0x60] sm:$0xff] }
  0xea   :  { %v2813_v61 = vpack.c.bf16 %v2172_v60, %v2171_v59 }
  0xeb   :  { %2108 = vmatmul.mubr.bf16.vlgmr.msra.gmra.mrb[20].mxu0 %v118_v6 }
  0xec   :  { %2149 = vmatmul.mubr.bf16.vlgmr.msra.gmra.mrb[20].mxu1 %v120_v7  ;;  %2792 = vmatpush3.bf16.msra.mxu0 %v2789_v28 }
  0xed   :  { %2794 = vmatprep.subr.bf16.mxu0 %v2793_v30 }
  0xf0   :  { %2796 = vmatpush3.bf16.msra.mxu0 %v2793_v30 }
  0xf1   :  { %2798 = vmatprep.subr.bf16.mxu0 %v2797_v33 }
  0xf4   :  { %2800 = vmatpush3.bf16.msra.mxu0 %v2797_v33 }
  0xf5   :  { %2802 = vmatprep.subr.bf16.mxu0 %v2801_v36 }
  0xf8   :  { %2804 = vmatpush3.bf16.msra.mxu0 %v2801_v36 }
  0xf9   :  { %2806 = vmatprep.subr.bf16.mxu0 %v2805_v39 }
  0xfc   :  { %2808 = vmatpush3.bf16.msra.mxu0 %v2805_v39 }
  0xfd   :  { %2810 = vmatprep.subr.bf16.mxu0 %v2809_v58 }
 0x100   :  { %2812 = vmatpush3.bf16.msra.mxu0 %v2809_v58 }
 0x101   :  { %2814 = vmatprep.subr.bf16.mxu0 %v2813_v61 }
 0x104   :  { %2816 = vmatpush3.bf16.msra.mxu0 %v2813_v61 }
 0x105   :  { %2818 = vmatprep.subr.bf16.mxu0 %v2817_v0 }
 0x108   :  { %2820 = vmatpush3.bf16.msra.mxu0 %v2817_v0 }
 0x11e   :  { %v2488_v8 = vpop.f32.mrb[0].mxu0 }
 0x11f   :  { %v2510_v9 = vpop.f32.mrb[0].mxu1  ;;  %v2489_v11 = vpop.f32.mrb[1].mxu0 }
 0x120   :  { %v2490_v12 = vadd.f32 %v2489_v11, %v2488_v8  ;;  %v2511_v13 = vpop.f32.mrb[1].mxu1  ;;  %v2491_v14 = vpop.f32.mrb[2].mxu0 }
 0x121   :  { %v2512_v15 = vadd.f32 %v2511_v13, %v2510_v9  ;;  %v2513_v16 = vpop.f32.mrb[2].mxu1  ;;  %v2492_v17 = vpop.f32.mrb[3].mxu0 }
 0x122   :  { %v1700_v18 = vadd.f32 %v2490_v12, %v2278_v10  ;;  %v2493_v19 = vadd.f32 %v2492_v17, %v2491_v14  ;;  %v2514_v20 = vpop.f32.mrb[3].mxu1 }
 0x123   :  { %v2515_v21 = vadd.f32 %v2514_v20, %v2513_v16 }
 0x124   :  { %v1741_v22 = vadd.f32 %v2512_v15, %v1700_v18  ;;  %v1703_v23 = vadd.f32 %v2493_v19, %v2278_v10 }
 0x126   :  { %v1744_v24 = vadd.f32 %v2515_v21, %v1703_v23 }
 0x13e   :  { %v2532_v40 = vpop.f32.mrb[4].mxu0 }
 0x13f   :  { %v2554_v41 = vpop.f32.mrb[4].mxu1  ;;  %v2533_v42 = vpop.f32.mrb[5].mxu0 }
 0x140   :  { %v2534_v43 = vadd.f32 %v2533_v42, %v2532_v40  ;;  %v2555_v44 = vpop.f32.mrb[5].mxu1  ;;  %v2535_v45 = vpop.f32.mrb[6].mxu0 }
 0x141   :  { %v2556_v46 = vadd.f32 %v2555_v44, %v2554_v41  ;;  %v2557_v47 = vpop.f32.mrb[6].mxu1  ;;  %v2536_v48 = vpop.f32.mrb[7].mxu0 }
 0x142   :  { %v1782_v49 = vadd.f32 %v2534_v43, %v1741_v22  ;;  %v2537_v50 = vadd.f32 %v2536_v48, %v2535_v45  ;;  %v2558_v51 = vpop.f32.mrb[7].mxu1 }
 0x143   :  { %v2559_v52 = vadd.f32 %v2558_v51, %v2557_v47 }
 0x144   :  { %v1823_v53 = vadd.f32 %v2556_v46, %v1782_v49  ;;  %v1785_v54 = vadd.f32 %v2537_v50, %v1744_v24 }
 0x146   :  { %v1826_v55 = vadd.f32 %v2559_v52, %v1785_v54 }
 0x15e   :  { %v2576_v1 = vpop.f32.mrb[8].mxu0 }
 0x15f   :  { %v2598_v2 = vpop.f32.mrb[8].mxu1  ;;  %v2577_v3 = vpop.f32.mrb[9].mxu0 }
 0x160   :  { %v2599_v4 = vpop.f32.mrb[9].mxu1  ;;  %v2578_v5 = vadd.f32 %v2577_v3, %v2576_v1  ;;  %v2579_v7 = vpop.f32.mrb[10].mxu0  ;;  %v2471_v3 = vld [vmem:[%s3227_s4] ss:$0 sm:$0xff] }
 0x161   :  { %v2600_v6 = vadd.f32 %v2599_v4, %v2598_v2  ;;  %v2601_v8 = vpop.f32.mrb[10].mxu1  ;;  %v2580_v9 = vpop.f32.mrb[11].mxu0 }
 0x162   :  { %v2602_v10 = vpop.f32.mrb[11].mxu1  ;;  %v1864_v11 = vadd.f32 %v2578_v5, %v1823_v53  ;;  %v2581_v12 = vadd.f32 %v2580_v9, %v2579_v7 }
 0x163   :  { %v2603_v13 = vadd.f32 %v2602_v10, %v2601_v8 }
 0x164   :  { %v1905_v14 = vadd.f32 %v2600_v6, %v1864_v11  ;;  %v1867_v15 = vadd.f32 %v2581_v12, %v1826_v55 }
 0x166   :  { %v1908_v16 = vadd.f32 %v2603_v13, %v1867_v15 }
 0x17e   :  { %v2620_v17 = vpop.f32.mrb[12].mxu0 }
 0x17f   :  { %v2642_v18 = vpop.f32.mrb[12].mxu1  ;;  %v2621_v19 = vpop.f32.mrb[13].mxu0 }
 0x180   :  { %v2622_v20 = vadd.f32 %v2621_v19, %v2620_v17  ;;  %v2643_v21 = vpop.f32.mrb[13].mxu1  ;;  %v2623_v22 = vpop.f32.mrb[14].mxu0 }
 0x181   :  { %v2644_v23 = vadd.f32 %v2643_v21, %v2642_v18  ;;  %v2645_v24 = vpop.f32.mrb[14].mxu1  ;;  %v2624_v25 = vpop.f32.mrb[15].mxu0 }
 0x182   :  { %v1946_v26 = vadd.f32 %v2622_v20, %v1905_v14  ;;  %v2625_v27 = vadd.f32 %v2624_v25, %v2623_v22  ;;  %v2646_v28 = vpop.f32.mrb[15].mxu1 }
 0x183   :  { %v2647_v29 = vadd.f32 %v2646_v28, %v2645_v24 }
 0x184   :  { %v1987_v30 = vadd.f32 %v2644_v23, %v1946_v26  ;;  %v1949_v31 = vadd.f32 %v2625_v27, %v1908_v16 }
 0x186   :  { %v1990_v32 = vadd.f32 %v2647_v29, %v1949_v31 }
 0x19e   :  { %v2664_v33 = vpop.f32.mrb[16].mxu0 }
 0x19f   :  { %v2686_v34 = vpop.f32.mrb[16].mxu1  ;;  %v2665_v35 = vpop.f32.mrb[17].mxu0 }
 0x1a0   :  { %v2666_v36 = vadd.f32 %v2665_v35, %v2664_v33  ;;  %v2687_v37 = vpop.f32.mrb[17].mxu1  ;;  %v2667_v38 = vpop.f32.mrb[18].mxu0 }
 0x1a1   :  { %v2688_v39 = vadd.f32 %v2687_v37, %v2686_v34  ;;  %v2689_v40 = vpop.f32.mrb[18].mxu1  ;;  %v2668_v41 = vpop.f32.mrb[19].mxu0 }
 0x1a2   :  { %v2028_v42 = vadd.f32 %v2666_v36, %v1987_v30  ;;  %v2669_v43 = vadd.f32 %v2668_v41, %v2667_v38  ;;  %v2690_v44 = vpop.f32.mrb[19].mxu1 }
 0x1a3   :  { %v2691_v45 = vadd.f32 %v2690_v44, %v2689_v40 }
 0x1a4   :  { %v2069_v46 = vadd.f32 %v2688_v39, %v2028_v42  ;;  %v2031_v47 = vadd.f32 %v2669_v43, %v1990_v32 }
 0x1a6   :  { %v2072_v48 = vadd.f32 %v2691_v45, %v2031_v47 }
 0x1be   :  { %v2708_v49 = vpop.f32.mrb[20].mxu0 }
 0x1bf   :  { %v2730_v50 = vpop.f32.mrb[20].mxu1  ;;  %v2709_v51 = vpop.f32.mrb[21].mxu0 }
 0x1c0   :  { %v2731_v52 = vpop.f32.mrb[21].mxu1  ;;  %v2710_v53 = vadd.f32 %v2709_v51, %v2708_v49  ;;  %v2711_v55 = vpop.f32.mrb[22].mxu0 }
 0x1c1   :  { %v2732_v54 = vadd.f32 %v2731_v52, %v2730_v50  ;;  %v2733_v56 = vpop.f32.mrb[22].mxu1  ;;  %v2712_v57 = vpop.f32.mrb[23].mxu0 }
 0x1c2   :  { %v2734_v58 = vpop.f32.mrb[23].mxu1  ;;  %v2110_v59 = vadd.f32 %v2710_v53, %v2069_v46  ;;  %v2713_v60 = vadd.f32 %v2712_v57, %v2711_v55 }
 0x1c3   :  { %v2735_v61 = vadd.f32 %v2734_v58, %v2733_v56 }
 0x1c4   :  { %v2151_v62 = vadd.f32 %v2732_v54, %v2110_v59  ;;  %v2113_v63 = vadd.f32 %v2713_v60, %v2072_v48 }
 0x1c6   :  { %v2157_v0 = vmax.f32 %v2151_v62, 0.0  ;;  %v2154_v1 = vadd.f32 %v2735_v61, %v2113_v63 }
 0x1c8   :  { %v2158_v2 = vmax.f32 %v2154_v1, 0.0  ;;  %2786 = vmatprep.mubr.f32.mxu0 %v2157_v0 }
 0x1ca   :  { %2787 = vmatmul.mubr.f32.vlgmr.msra.gmra.mrb[24].mxu0 %v2158_v2 }
 0x29d   :  { %v2788_v4 = vpop.f32.mrb[24].mxu0 }
 0x29e   :  { %v2254_v5 = vadd.f32 %v2788_v4, %v2471_v3  ;;  %v2248_v6 = vpop.f32.mrb[25].mxu0 }
 0x29f   :  { %v2249_v7 = vadd.f32 %v2471_v3, %v2248_v6 }
 0x2a0   :  { %2259 = vst.msk [vmem:[#allocation7 + $0x8] sm:$0xff] %vm2257_vm0, %v2254_v5 }
 0x2a1   :  { %2258 = vst.msk [vmem:[#allocation7] sm:$0xff] %vm2257_vm0, %v2249_v7 }
 0x2a2   :  { %2264 = vsyncadd [#allocation4], 128  ;;  %s3100_s26 = smov [#allocation7]  }
 0x2a3   :  { %s2265_s27 = sshll.u32 %s3100_s26, 4  ;;  %s2266_s27 = int_to_ptr.vmem [resolvable:$true] %s2265_s27 }
 0x2a4   :  { %s3066_s28 = scalar_lea.vmem %s2266_s27, 128  ;;  %s3070_s29 = scalar_lea.vmem %s2266_s27, 256 }
 0x2a5   :  { %p3067_p2 = scmp.ne.s32.totalorder %s2266_s27, %s3066_s28  ;;  %p3071_p3 = scmp.lt.s32.totalorder %s2266_s27, %s2266_s27 }
 0x2a6   :  { %p3072_p4 = scmp.lt.s32.totalorder %s3070_s29, %s3066_s28 }
 0x2a8   :  { %p3073_p5 = por %p3072_p4, %p3071_p3 }
 0x2aa   :  { %p3074_p6 = pnand %p3073_p5, %p3067_p2 }
 0x2ac   :  { %3077 = shalt.err (!%p3074_p6)
}
 0x2ad   :  { %s3078_s6 = scalar_lea.hbm %s3228_s5, 128 }
 0x2ae   :  { %p3079_p7 = scmp.ne.s32.totalorder %s3228_s5, %s3078_s6  ;;  %p3082_p8 = scmp.lt.u32.totalorder %s3078_s6, %s3228_s5 }
 0x2b0   :  { %p3084_p9 = pnand %p3082_p8, %p3079_p7 }
 0x2b2   :  { %3087 = shalt.err (!%p3084_p9)
}
 0x2b3   :  { %s3101_s11 = smov 128   ;;  %s3102_s12 = smov 8  }
 0x2b4   :  { %2271 = dma.vmem_to_hbm [thread:$0]  %s2266_s27, 128, %s3228_s5, [#allocation4], %s3101_s11, %s3101_s11, %s3102_s12  }
 0x2b5   :  { %3092 = dma.done.wait [#allocation4], 256  }
 0x2b6   :  { %3093 = vsyncadd [#allocation4], 4294967040 }
 0x2b7   :  { %2275 = vsyncpa [#allocation3], 1 }
 0x2b8   :  { %2276 = vsyncpa [#allocation6], 1 }
 0x2b9   :  { %2277 = vsyncpa [#allocation4], 1 }

</bundles_post_ra>
